<compile_context>
chip_gen: v6e
topology: v6e:2x2x1
jax: 0.10.0
libtpu: 0.0.40
codegen_flags: <defaults>
</compile_context>

<pallas_src>
import jax
import jax.numpy as jnp
from jax import lax
from jax.experimental import pallas as pl
from jax.experimental.pallas import tpu as pltpu

C_IN = 3
C_OUT = 256
K = 3                      # kernel size, padding=1 ("same" output)
K_RAW = K * K * C_IN + 1   # 27 conv taps + 1 bias element = 28
K_PAD = 32                 # pad contraction to a sublane-friendly 32


def _conv_matmul_kernel(w_ref, p_ref, o_ref):
    # w_ref: (C_OUT, K_PAD)   resident flattened weights (+ bias column, zero-padded)
    # p_ref: (1, K_PAD, TM)   im2col tile: contraction rows, spatial on the lane axis
    # o_ref: (1, C_OUT, TM)   channel-major output tile (lane-dense along spatial)
    o_ref[0] = jnp.dot(
        w_ref[...], p_ref[0], preferred_element_type=jnp.float32
    ).astype(o_ref.dtype)


def _choose_tile_m(hw, n):
    # Lane-dense spatial tiles: floor 128 (avoid masked vst.msk stores), cap 2048
    # (double-buffered blocks fit every generation's default scoped VMEM), and
    # prefer >= 4 total grid steps so both v7x TensorCores get pipelined work.
    for tm in (2048, 1024, 512, 256, 128):
        if hw >= tm and pl.cdiv(hw, tm) * n >= 4:
            return tm
    return 128


def conv2d_3x3_pallas(x_nchw, weight, bias, *, use_bf16=True):
    """x_nchw: (N, 3, H, W) f32; weight: (256, 3, 3, 3) f32 (OIHW); bias: (256,) f32."""
    N, C, H, W = x_nchw.shape
    assert C == C_IN
    hw = H * W
    op_dtype = jnp.bfloat16 if use_bf16 else x_nchw.dtype
    out_dtype = jnp.float32

    # ---- wrapper-side im2col, already channel-major: (N, 32, H*W) -------------------
    x_pad = jnp.pad(x_nchw, ((0, 0), (0, 0), (1, 1), (1, 1)))            # (N, C, H+2, W+2)
    taps = [x_pad[:, :, kh:kh + H, kw:kw + W]                            # ordered (kh, kw, c)
            for kh in range(K) for kw in range(K)]
    patch = jnp.concatenate(taps, axis=1).reshape(N, K * K * C_IN, hw)   # (N, 27, HW)
    ones = jnp.ones((N, 1, hw), dtype=patch.dtype)                       # bias "ones" row
    patch = jnp.concatenate([patch, ones], axis=1)                       # (N, 28, HW)
    patch = jnp.pad(patch, ((0, 0), (0, K_PAD - K_RAW), (0, 0)))         # (N, 32, HW)
    patch = patch.astype(op_dtype)

    # OIHW -> (co, kh, kw, ci) -> (256, 27); append bias column; pad cols to 32.
    w_cm = jnp.transpose(weight, (0, 2, 3, 1)).reshape(C_OUT, K * K * C_IN)
    w_cm = jnp.concatenate([w_cm, bias.reshape(C_OUT, 1)], axis=1)       # (256, 28)
    w_cm = jnp.pad(w_cm, ((0, 0), (0, K_PAD - K_RAW))).astype(op_dtype)  # (256, 32)

    # ---- spatial grid over (N, HW tiles); padded spatial cols are sliced off --------
    tm = _choose_tile_m(hw, N)
    hw_pad = pl.cdiv(hw, tm) * tm
    if hw_pad != hw:
        patch = jnp.pad(patch, ((0, 0), (0, 0), (0, hw_pad - hw)))

    op_bytes = jnp.dtype(op_dtype).itemsize
    cost = pl.CostEstimate(
        flops=2 * N * hw_pad * K_PAD * C_OUT,
        transcendentals=0,
        bytes_accessed=op_bytes * (N * K_PAD * hw_pad + K_PAD * C_OUT)
        + 4 * N * C_OUT * hw_pad,
    )

    out_cm = pl.pallas_call(
        _conv_matmul_kernel,
        out_shape=jax.ShapeDtypeStruct((N, C_OUT, hw_pad), out_dtype),
        grid_spec=pltpu.PrefetchScalarGridSpec(
            num_scalar_prefetch=0,
            grid=(N, hw_pad // tm),
            in_specs=[
                pl.BlockSpec((C_OUT, K_PAD), lambda n, i: (0, 0)),     # weights, resident
                pl.BlockSpec((1, K_PAD, tm), lambda n, i: (n, 0, i)),  # patch tile
            ],
            out_specs=pl.BlockSpec((1, C_OUT, tm), lambda n, i: (n, 0, i)),
        ),
        compiler_params=pltpu.CompilerParams(
            dimension_semantics=("parallel", "parallel")),
        cost_estimate=cost,
    )(w_cm, patch)

    if hw_pad != hw:
        out_cm = out_cm[:, :, :hw]
    # Already NCHW-flat: free reshape, no transpose.
    return out_cm.reshape(N, C_OUT, H, W)


def _reference_conv(x_nchw, weight, bias):
    out = lax.conv_general_dilated(
        x_nchw, weight, window_strides=(1, 1), padding=((1, 1), (1, 1)),
        dimension_numbers=("NCHW", "OIHW", "NCHW"))
    return out + bias[None, :, None, None]


if __name__ == "__main__":
    key = jax.random.PRNGKey(0)
    kx, kw, kb = jax.random.split(key, 3)

    # Small shapes consistent with the module: batch=2, in_channels=3, spatial=16
    N, H, W = 2, 16, 16
    x = jax.random.normal(kx, (N, C_IN, H, W), dtype=jnp.float32)

    # Deterministic parameter init (Conv2d default-style uniform bound)
    fan_in = C_IN * K * K
    bound = 1.0 / (fan_in ** 0.5)
    weight = jax.random.uniform(kw, (C_OUT, C_IN, K, K), dtype=jnp.float32,
                                minval=-bound, maxval=bound)
    bias = jax.random.uniform(kb, (C_OUT,), dtype=jnp.float32,
                              minval=-bound, maxval=bound)

    out = jax.block_until_ready(conv2d_3x3_pallas(x, weight, bias, use_bf16=True))
    ref = jax.block_until_ready(_reference_conv(x, weight, bias))

    assert out.shape == (N, C_OUT, H, W)
    # bf16 operands with f32 accumulation over a 27-tap contraction: ~1e-3 level error.
    max_err = float(jnp.max(jnp.abs(out - ref)))
    assert jnp.allclose(out, ref, atol=3e-2, rtol=3e-2), (
        f"mismatch vs lax.conv reference (max abs err {max_err})")

    print("KERNEL_OK")
</pallas_src>

<mosaic_0001>
module attributes {stable_mosaic.version = 11 : i64} {
  func.func @_conv_matmul_kernel(%arg0: i32, %arg1: i32, %arg2: memref<256x32xbf16, #tpu.memory_space<vmem>>, %arg3: memref<1x32x128xbf16, #tpu.memory_space<vmem>>, %arg4: memref<1x256x128xf32, #tpu.memory_space<vmem>>) attributes {dimension_semantics = [#tpu.dimension_semantics<parallel>, #tpu.dimension_semantics<parallel>], iteration_bounds = array<i64: 2, 2>, scalar_prefetch = 0 : i64, scratch_operands = 0 : i64, tpu.core_type = #tpu.core_type<tc>, window_params = [{pipeline_mode = #tpu.pipeline_mode<synchronous>, transform_indices = @transform_0, window_bounds = array<i64: 256, 32>}, {transform_indices = @transform_1, window_bounds = array<i64: 1, 32, 128>}, {transform_indices = @transform_2, window_bounds = array<i64: 1, 256, 128>}]} {
    %c0 = arith.constant 0 : index
    %c0_0 = arith.constant 0 : index
    %0 = vector.load %arg2[%c0, %c0_0] : memref<256x32xbf16, #tpu.memory_space<vmem>>, vector<256x32xbf16>
    %c0_1 = arith.constant 0 : index
    %c0_2 = arith.constant 0 : index
    %c0_3 = arith.constant 0 : index
    %1 = vector.load %arg3[%c0_1, %c0_2, %c0_3] : memref<1x32x128xbf16, #tpu.memory_space<vmem>>, vector<1x32x128xbf16>
    %2 = vector.shape_cast %1 : vector<1x32x128xbf16> to vector<32x128xbf16>
    %cst = arith.constant dense<0.000000e+00> : vector<256x128xf32>
    %3 = tpu.matmul %0, %2, %cst {dimension_numbers = #tpu.dot_dimension_numbers<[1], [0], [0], [1], [0, 0, 1, 1], [], []>} : vector<256x32xbf16>, vector<32x128xbf16>, vector<256x128xf32> -> vector<256x128xf32>
    %c0_4 = arith.constant 0 : index
    %c0_5 = arith.constant 0 : index
    %c0_6 = arith.constant 0 : index
    %4 = vector.load %arg4[%c0_4, %c0_5, %c0_6] : memref<1x256x128xf32, #tpu.memory_space<vmem>>, vector<1x256x128xf32>
    %5 = vector.shape_cast %4 : vector<1x256x128xf32> to vector<256x128xf32>
    %6 = vector.shape_cast %3 : vector<256x128xf32> to vector<1x256x128xf32>
    tpu.vector_store %arg4[%c0_4, %c0_5, %c0_6], %6 {strides = array<i32>} : memref<1x256x128xf32, #tpu.memory_space<vmem>>, vector<1x256x128xf32>,
    return
  }
  func.func @transform_0(%arg0: i32, %arg1: i32) -> (i32, i32) {
    %c0_i32 = arith.constant 0 : i32
    %c0_i32_0 = arith.constant 0 : i32
    %c0_i32_1 = arith.constant 0 : i32
    return %c0_i32, %c0_i32_0 : i32, i32
  }
  func.func @transform_1(%arg0: i32, %arg1: i32) -> (i32, i32, i32) {
    %c0_i32 = arith.constant 0 : i32
    %c0_i32_0 = arith.constant 0 : i32
    return %arg0, %c0_i32, %arg1 : i32, i32, i32
  }
  func.func @transform_2(%arg0: i32, %arg1: i32) -> (i32, i32, i32) {
    %c0_i32 = arith.constant 0 : i32
    %c0_i32_0 = arith.constant 0 : i32
    return %arg0, %c0_i32, %arg1 : i32, i32, i32
  }
}

</mosaic_0001>

<bundles_post_ra>
// kernel: tpu_custom_call.1
= control target key start
LH: loop header
LB: loop body
LE: loop exit
PB: predicated region body
PF: predicated region fallthrough
CT: control target
= control target key end

     0   :  { %7 = vsyncpa [#allocation4], 0  ;;  %s1245_s0 = inlined_call_operand.vmem [shape: bf16[256,32], index: 0, kind: input, shape index: {}]   ;;  %s1246_s1 = inlined_call_operand.vmem [shape: bf16[2,32,256], index: 1, kind: input, shape index: {}]   ;;  %s1247_s2 = inlined_call_operand.hbm [shape: f32[2,256,256], index: 2, kind: output, shape index: {}]  }
   0x1   :  { %9 = vsyncpa [#allocation4 + $0x1], 0  ;;  %s996_s9 = smov 0   ;;  %s998_s10 = smov 0  }
   0x2   :  { %s1000_s11 = smov 0   ;;  %s1002_s12 = smov 0  }
   0x3   :  { %s1004_s13 = smov 0   ;;  %s1006_s14 = smov 0  }
   0x4   :  { %s1008_s15 = smov 0   ;;  %s1010_s16 = smov 0  }
   0x5 LB: > { %s684_s17 = sadd.s32 4294967295, %s975_s16   ;;  %s685_s18 = sadd.s32 4294967294, %s975_s16   ;;  %s975_s16 = sphi %s1010_s16, %s15_s16   ;;  %s971_s15 = sphi %s1008_s15, %s1257_s15   ;;  %s967_s14 = sphi %s1006_s14, %s1256_s14   ;;  %s963_s13 = sphi %s1004_s13, %s1255_s13   ;;  %s959_s12 = sphi %s1002_s12, %s1254_s12   ;;  %s955_s11 = sphi %s1000_s11, %s1253_s11   ;;  %s951_s10 = sphi %s998_s10, %s1252_s10   ;;  %s947_s9 = sphi %s996_s9, %s1251_s9  }
   0x6   : > { %s24_s19 = sadd.s32 1, %s967_s14  ;;  %s27_s20 = sadd.s32 1, %s971_s15 }
   0x7   : > { %p25_p0 = scmp.ge.s32.totalorder %s24_s19, 2  ;;  %p64_p1 = scmp.ne.s32.totalorder %s955_s11, %s951_s10 }
   0x8   : > { %p65_p2 = scmp.eq.s32.totalorder %s975_s16, 0  ;;  %p96_p5 = scmp.eq.s32.totalorder %s684_s17, 3 }
   0x9   : > { %s1259_s19 = smov (%p25_p0, %s24_s19), 0  ;;  %s1261_s20 = smov (!%p25_p0, %s27_s20), %s971_s15 }
   0xa   : > { %s53_s21 = ssub.s32 %s967_s14, %s1259_s19  ;;  %p1048_p3 = por %p65_p2, %p64_p1 }
   0xb   : > { %p29_p4 = scmp.ge.s32.totalorder %s1261_s20, 2  ;;  %p101_p6 = scmp.ne.s32.totalorder %s951_s10, %s947_s9 }
   0xc   : > { %p102_p7 = scmp.eq.s32.totalorder %s685_s18, 3  ;;  %p1056_p8 = por %p96_p5, %p64_p1 }
   0xd   : > { %s1263_s20 = smov (%p29_p4, %s1261_s20), 0  ;;  %s57_s27 = sadd.s32 1, %s955_s11 }
   0xe   : > { %p1060_p9 = por %p102_p7, %p101_p6  ;;  %s52_s25 = ssub.s32 %s971_s15, %s1263_s20 }
   0xf   : > { %s54_s26 = sor.u32 %s53_s21, %s52_s25  ;;  %p687_p11 = scmp.ge.s32.totalorder %s975_s16, 4 }
  0x10   : > { %p55_p10 = scmp.eq.s32.totalorder %s54_s26, 0 }
  0x11   : > { %121 = sbr.rel (%p687_p11) target bundleno = 30 (0x1e), region = 20 }
  0x12   : > { %s1068_s28 = scalar_select %p55_p10, %s955_s11, %s57_s27  }
  0x16   : > { %124 = sbr.rel (!%p1048_p3) target bundleno = 30 (0x1e), region = 24  ;;  %s126_s29 = sand.u32 (%p1048_p3), 1, %s955_s11  }
  0x17   : > { %s689_s30 = sshll.u32 (%p1048_p3), %s971_s15, 3  ;;  %s688_s3 = sshll.u32 (%p1048_p3), %s126_s29, 4 }
  0x18   : > { %s130_s4 = sadd.s32 (%p1048_p3), %s967_s14, %s689_s30  ;;  %s128_s17 = scalar_lea.vmem (%p1048_p3), [#allocation2], %s688_s3 }
  0x19   : > { %s690_s5 = sshll.u32 (%p1048_p3), %s130_s4, 2 }
  0x1a   : > { %s132_s8 = scalar_lea.vmem (%p1048_p3), %s1246_s1, %s690_s5 }
  0x1b   : > { %v149_v0 = vld [vmem:[%s132_s8] sm:$0xf]  ;;  %v151_v1 = vld [vmem:[%s132_s8 + $0x8] sm:$0xf]  ;;  %v153_v2 = vld [vmem:[%s132_s8 + $0x10] sm:$0xf] }
  0x1c   : > { %150 = vst [vmem:[%s128_s17] sm:$0xf] %v149_v0  ;;  %152 = vst [vmem:[%s128_s17 + $0x4] sm:$0xf] %v151_v1  ;;  %v155_v3 = vld [vmem:[%s132_s8 + $0x18] sm:$0xf] }
  0x1d   : > { %154 = vst [vmem:[%s128_s17 + $0x8] sm:$0xf] %v153_v2  ;;  %156 = vst [vmem:[%s128_s17 + $0xc] sm:$0xf] %v155_v3 }
  0x1e PF: > { %p691_p12 = scmp.ge.s32.totalorder %s975_s16, 1  ;;  %p187_p13 = scmp.lt.s32.totalorder %s975_s16, 5 }
  0x20   : > { %p188_p0 = pnand %p691_p12, %p187_p13 }
  0x21   : > { %s1082_s18 = sand.u32 (!%p188_p0), 1, %s951_s10   ;;  %s729_s4 = sshll.u32 (!%p188_p0), %s963_s13, 6 }
  0x22   : > { %191 = sbr.rel (%p188_p0) target bundleno = 287 (0x11f), region = 65  ;;  %s692_s25 = sshll.u32 (!%p188_p0), %s1082_s18, 4 }
  0x23   : > { %s196_s29 = scalar_lea.vmem (!%p188_p0), [#allocation2], %s692_s25  ;;  %s693_s30 = sshll.u32 (!%p188_p0), %s1082_s18, 8 }
  0x24   : > { %s1150_s3 = scalar_lea.vmem (!%p188_p0), [#allocation3], %s693_s30  ;;  %s598_s5 = sadd.s32 (!%p188_p0), %s959_s12, %s729_s4 }
  0x25   : > { %s730_s13 = sshll.u32 (!%p188_p0), %s598_s5, 7  ;;  %s601_s6 = sshll.u32 (!%p188_p0), %s1150_s3, 4  ;;  %s1188_s6 = int_to_ptr.vmem [resolvable:$true] %s601_s6 }
  0x26   : > { %s1186_s8 = scalar_lea.hbm (!%p188_p0), %s1247_s2, %s730_s13  ;;  %s587_s17 = scalar_lea.sflag (!%p188_p0), [#allocation4], %s1082_s18 }
  0x27   : > { %v867_v4 = vld [vmem:[%s1245_s0] sm:$0xff]   ;;  %vm344_vm0 = vcmask 261120   ;;  %v865_v6 = vld [vmem:[%s196_s29 + $0x8] sm:$0xff]   ;;  %v871_v10 = vld [vmem:[%s1245_s0 + $0x10] sm:$0xff]   ;;  %s883_s21 = scalar_lea.vmem %s1188_s6, 4096  ;;  %s977_s22 = smov [#allocation3]  }
  0x28   : > { %v868_v5 = vld [vmem:[%s1245_s0 + $0x40] sm:$0xff]   ;;  %755 = vmatprep.mubr.msk.bf16.mxu0 %vm344_vm0, %v867_v4  ;;  %751 = vmatprep.subr.bf16.mxu0 %v865_v6  ;;  %v869_v8 = vld [vmem:[%s1245_s0 + $0x8] sm:$0xff]   ;;  %v872_v11 = vld [vmem:[%s1245_s0 + $0x50] sm:$0xff]   ;;  %p884_p1 = scmp.ne.s32.totalorder %s1188_s6, %s883_s21  ;;  %s887_s25 = sshll.u32 %s977_s22, 4  ;;  %s888_s25 = int_to_ptr.vmem [resolvable:$false] %s887_s25 }
  0x29   : > { %771 = vmatprep.mubr.msk.bf16.mxu1 %vm344_vm0, %v868_v5  ;;  %v866_v7 = vld [vmem:[%s196_s29] sm:$0xff]   ;;  %787 = vmatprep.subr.bf16.mxu1 %v865_v6  ;;  %v870_v9 = vld [vmem:[%s1245_s0 + $0x48] sm:$0xff]   ;;  %v873_v12 = vld [vmem:[%s1245_s0 + $0x18] sm:$0xff]   ;;  %s889_s26 = scalar_lea.vmem %s888_s25, 8192  ;;  %p890_p4 = scmp.lt.s32.totalorder %s1188_s6, %s888_s25 }
  0x2a   : > { %752 = vmatpush3.bf16.msra.mxu0 %v865_v6  ;;  %789 = vmatpush3.bf16.msra.mxu1 %v865_v6  ;;  %v874_v13 = vld [vmem:[%s1245_s0 + $0x58] sm:$0xff]   ;;  %v875_v14 = vld [vmem:[%s1245_s0 + $0x20] sm:$0xff]   ;;  %v877_v16 = vld [vmem:[%s1245_s0 + $0x28] sm:$0xff]   ;;  %p885_p2 = pnand %p884_p1, %p1056_p8  ;;  %p891_p5 = scmp.lt.s32.totalorder %s889_s26, %s883_s21 }
  0x2b   : > { %753 = vmatprep.subr.bf16.mxu0 %v866_v7  ;;  %788 = vmatprep.subr.bf16.mxu1 %v866_v7  ;;  %v876_v15 = vld [vmem:[%s1245_s0 + $0x60] sm:$0xff]   ;;  %v878_v17 = vld [vmem:[%s1245_s0 + $0x68] sm:$0xff]   ;;  %v879_v18 = vld [vmem:[%s1245_s0 + $0x30] sm:$0xff]  }
  0x2c   : > { %v880_v19 = vld [vmem:[%s1245_s0 + $0x70] sm:$0xff]   ;;  %v881_v20 = vld [vmem:[%s1245_s0 + $0x38] sm:$0xff]   ;;  %p886_p3 = pneg %p885_p2  ;;  %p892_p6 = por %p891_p5, %p890_p4 }
  0x2d   : > { %v882_v21 = vld [vmem:[%s1245_s0 + $0x78] sm:$0xff]  }
  0x2e   : > { %754 = vmatpush3.bf16.msra.mxu0 %v866_v7  ;;  %790 = vmatpush3.bf16.msra.mxu1 %v866_v7  ;;  %p893_p7 = pnand %p892_p6, %p886_p3 }
  0x31   : > { %756 = vmatmul.mubr.msk.bf16.vlgmr.msra.gmra.mxu0 %vm344_vm0, %v869_v8  ;;  %772 = vmatmul.mubr.msk.bf16.vlgmr.msra.gmra.mxu1 %vm344_vm0, %v870_v9 }
  0x32   : > { %759 = vmatprep.mubr.msk.bf16.mxu0 %vm344_vm0, %v871_v10  ;;  %775 = vmatprep.mubr.msk.bf16.mxu1 %vm344_vm0, %v872_v11 }
  0x39   : > { %760 = vmatmul.mubr.msk.bf16.gmra.mxu0 %vm344_vm0, %v873_v12  ;;  %776 = vmatmul.mubr.msk.bf16.gmra.mxu1 %vm344_vm0, %v874_v13 }
  0x3a   : > { %763 = vmatprep.mubr.msk.bf16.mxu0 %vm344_vm0, %v875_v14  ;;  %779 = vmatprep.mubr.msk.bf16.mxu1 %vm344_vm0, %v876_v15 }
  0x41   : > { %764 = vmatmul.mubr.msk.bf16.gmra.mxu0 %vm344_vm0, %v877_v16  ;;  %780 = vmatmul.mubr.msk.bf16.gmra.mxu1 %vm344_vm0, %v878_v17 }
  0x42   : > { %767 = vmatprep.mubr.msk.bf16.mxu0 %vm344_vm0, %v879_v18  ;;  %783 = vmatprep.mubr.msk.bf16.mxu1 %vm344_vm0, %v880_v19 }
  0x49   : > { %768 = vmatmul.mubr.msk.bf16.gmra.mxu0 %vm344_vm0, %v881_v20  ;;  %784 = vmatmul.mubr.msk.bf16.gmra.mxu1 %vm344_vm0, %v882_v21 }
  0xf1   : > { %v757_v22 = vpop.f32.mrf.mxu0  ;;  %v773_v23 = vpop.f32.mrf.mxu1 }
  0xf2   : > { %556 = vst [vmem:[%s1150_s3 + $0x10] sm:$0xff] %v757_v22  ;;  %572 = vst [vmem:[%s1150_s3 + $0x90] sm:$0xff] %v773_v23 }
  0xf3   : > { %v427_v24 = vpop.f32.mrf.mxu0  ;;  %v491_v25 = vpop.f32.mrf.mxu1 }
  0xf4   : > { %554 = vst [vmem:[%s1150_s3] sm:$0xff] %v427_v24  ;;  %570 = vst [vmem:[%s1150_s3 + $0x80] sm:$0xff] %v491_v25 }
  0xf5   : > { %v758_v26 = vpop.f32.mrf.mxu0  ;;  %v774_v27 = vpop.f32.mrf.mxu1 }
  0xf6   : > { %557 = vst [vmem:[%s1150_s3 + $0x18] sm:$0xff] %v758_v26  ;;  %573 = vst [vmem:[%s1150_s3 + $0x98] sm:$0xff] %v774_v27 }
  0xf7   : > { %v430_v28 = vpop.f32.mrf.mxu0  ;;  %v494_v29 = vpop.f32.mrf.mxu1 }
  0xf8   : > { %555 = vst [vmem:[%s1150_s3 + $0x8] sm:$0xff] %v430_v28  ;;  %571 = vst [vmem:[%s1150_s3 + $0x88] sm:$0xff] %v494_v29 }
  0xf9   : > { %v761_v30 = vpop.f32.mrf.mxu0  ;;  %v777_v31 = vpop.f32.mrf.mxu1 }
  0xfa   : > { %560 = vst [vmem:[%s1150_s3 + $0x30] sm:$0xff] %v761_v30  ;;  %576 = vst [vmem:[%s1150_s3 + $0xb0] sm:$0xff] %v777_v31 }
  0xfb   : > { %v443_v32 = vpop.f32.mrf.mxu0  ;;  %v507_v33 = vpop.f32.mrf.mxu1 }
  0xfc   : > { %558 = vst [vmem:[%s1150_s3 + $0x20] sm:$0xff] %v443_v32  ;;  %574 = vst [vmem:[%s1150_s3 + $0xa0] sm:$0xff] %v507_v33 }
  0xfd   : > { %v762_v34 = vpop.f32.mrf.mxu0  ;;  %v778_v35 = vpop.f32.mrf.mxu1 }
  0xfe   : > { %561 = vst [vmem:[%s1150_s3 + $0x38] sm:$0xff] %v762_v34  ;;  %577 = vst [vmem:[%s1150_s3 + $0xb8] sm:$0xff] %v778_v35 }
  0xff   : > { %v446_v36 = vpop.f32.mrf.mxu0  ;;  %v510_v37 = vpop.f32.mrf.mxu1 }
 0x100   : > { %559 = vst [vmem:[%s1150_s3 + $0x28] sm:$0xff] %v446_v36  ;;  %575 = vst [vmem:[%s1150_s3 + $0xa8] sm:$0xff] %v510_v37 }
 0x101   : > { %v765_v38 = vpop.f32.mrf.mxu0  ;;  %v781_v39 = vpop.f32.mrf.mxu1 }
 0x102   : > { %564 = vst [vmem:[%s1150_s3 + $0x50] sm:$0xff] %v765_v38  ;;  %580 = vst [vmem:[%s1150_s3 + $0xd0] sm:$0xff] %v781_v39 }
 0x103   : > { %v459_v40 = vpop.f32.mrf.mxu0  ;;  %v523_v41 = vpop.f32.mrf.mxu1 }
 0x104   : > { %562 = vst [vmem:[%s1150_s3 + $0x40] sm:$0xff] %v459_v40  ;;  %578 = vst [vmem:[%s1150_s3 + $0xc0] sm:$0xff] %v523_v41 }
 0x105   : > { %v766_v42 = vpop.f32.mrf.mxu0  ;;  %v782_v43 = vpop.f32.mrf.mxu1 }
 0x106   : > { %565 = vst [vmem:[%s1150_s3 + $0x58] sm:$0xff] %v766_v42  ;;  %581 = vst [vmem:[%s1150_s3 + $0xd8] sm:$0xff] %v782_v43 }
 0x107   : > { %v462_v44 = vpop.f32.mrf.mxu0  ;;  %v526_v45 = vpop.f32.mrf.mxu1 }
 0x108   : > { %563 = vst [vmem:[%s1150_s3 + $0x48] sm:$0xff] %v462_v44  ;;  %579 = vst [vmem:[%s1150_s3 + $0xc8] sm:$0xff] %v526_v45 }
 0x109   : > { %v769_v46 = vpop.f32.mrf.mxu0  ;;  %v785_v47 = vpop.f32.mrf.mxu1 }
 0x10a   : > { %568 = vst [vmem:[%s1150_s3 + $0x70] sm:$0xff] %v769_v46  ;;  %584 = vst [vmem:[%s1150_s3 + $0xf0] sm:$0xff] %v785_v47 }
 0x10b   : > { %v475_v48 = vpop.f32.mrf.mxu0  ;;  %v539_v49 = vpop.f32.mrf.mxu1 }
 0x10c   : > { %566 = vst [vmem:[%s1150_s3 + $0x60] sm:$0xff] %v475_v48  ;;  %582 = vst [vmem:[%s1150_s3 + $0xe0] sm:$0xff] %v539_v49 }
 0x10d   : > { %v770_v50 = vpop.f32.mrf.mxu0  ;;  %v786_v51 = vpop.f32.mrf.mxu1 }
 0x10e   : > { %569 = vst [vmem:[%s1150_s3 + $0x78] sm:$0xff] %v770_v50  ;;  %585 = vst [vmem:[%s1150_s3 + $0xf8] sm:$0xff] %v786_v51 }
 0x10f   : > { %v478_v52 = vpop.f32.mrf.mxu0  ;;  %v542_v53 = vpop.f32.mrf.mxu1 }
 0x110   : > { %567 = vst [vmem:[%s1150_s3 + $0x68] sm:$0xff] %v478_v52  ;;  %583 = vst [vmem:[%s1150_s3 + $0xe8] sm:$0xff] %v542_v53 }
 0x111   : > { %896 = shalt.err (!%p893_p7)
}
 0x112   : > { %s897_s27 = scalar_lea.hbm %s1186_s8, 4096  ;;  %s901_s3 = scalar_lea.hbm %s1247_s2, 16384 }
 0x113   : > { %p898_p10 = scmp.ne.s32.totalorder %s1186_s8, %s897_s27  ;;  %p902_p13 = scmp.lt.s32.totalorder %s1186_s8, %s1247_s2 }
 0x114   : > { %p903_p0 = scmp.lt.s32.totalorder %s901_s3, %s897_s27 }
 0x115   : > { %p899_p11 = pnand %p898_p10, %p1056_p8 }
 0x116   : > { %p904_p1 = por %p903_p0, %p902_p13 }
 0x117   : > { %p900_p12 = pneg %p899_p11 }
 0x119   : > { %p905_p2 = pnand %p904_p1, %p900_p12 }
 0x11b   : > { %908 = shalt.err (!%p905_p2)
}
 0x11c   : > { %s978_s13 = smov 128   ;;  %s979_s12 = smov 256  }
 0x11d   : > { %s980_s7 = smov 8  }
 0x11e   : > { %791 = dma.vmem_to_hbm [thread:$0]  (%p1056_p8), %s1188_s6, 4096, %s1186_s8, %s587_s17, %s978_s13, %s979_s12, %s980_s7  }
 0x11f PF: > { %p797_p3 = scmp.ge.s32.totalorder %s975_s16, 2  ;;  %s616_s21 = sand.u32 1, %s947_s9  }
 0x120   : > { %s617_s22 = scalar_lea.sflag [#allocation4], %s616_s21 }
 0x121   : > { %p794_p4 = pnand %p797_p3, %p1060_p9 }
 0x123   : > { %p795_p5 = pneg %p794_p4 }
 0x125   : > { %942 = dma.done.wait (%p795_p5), %s617_s22, 4096  }
 0x126   : > { %944 = vsyncadd (%p795_p5), %s617_s22, 4294963200  ;;  %s15_s16 = sadd.s32 1, %s975_s16   ;;  %s1251_s9 = smov %s951_s10 }
 0x127   : > { %p12_p6 = scmp.ge.s32.totalorder %s15_s16, 6   ;;  %s1252_s10 = smov %s955_s11 }
 0x128   : > { %s1253_s11 = smov %s1068_s28  ;;  %s1254_s12 = smov %s967_s14 }
 0x129   : > { %s1255_s13 = smov %s971_s15  ;;  %s1256_s14 = smov %s1259_s19 }
 0x12a   : > { %s1257_s15 = smov %s1263_s20  ;;  %14 = sbr.rel (!%p12_p6) target bundleno = 5 (0x5), region = 109 }
 0x12f   :  { %622 = vsyncpa [#allocation4], 1 }
 0x130   :  { %624 = vsyncpa [#allocation4 + $0x1], 1 }

</bundles_post_ra>
